<compile_context>
chip_gen: v7x
topology: tpu7x:2x2x1
jax: 0.10.0
libtpu: 0.0.40
codegen_flags: <defaults>
</compile_context>

<pallas_src>
import jax
import jax.numpy as jnp
from jax.experimental import pallas as pl
from jax.experimental.pallas import tpu as pltpu

_SUBLANE = 8       # TPU sublane width (second-minor tiling unit)
_MAX_TM = 4096     # max batch-tile rows: ~0.5 MiB x-block + ~2 MiB f32 out-block
                   # -> ~5-6 MiB double-buffered, safe on v5e/v6e/v7x defaults.


def _round_up(n: int, m: int) -> int:
    return ((n + m - 1) // m) * m


def _pick_tm(b: int) -> int:
    """Batch-tile rows.

    Tiny batches use the full extent (single block).  Otherwise pick a multiple
    of 8 that yields at least 2 grid steps (so the "parallel" batch axis can be
    sharded across v7x's 2 TensorCores) while staying below _MAX_TM.
    """
    if b <= _SUBLANE:
        return b
    return min(_MAX_TM, _round_up(pl.cdiv(b, 2), _SUBLANE))


# --------------------------------------------------------------------------
# Kernel: one batch-tiled linear layer  o = x @ W + b
# --------------------------------------------------------------------------
def _linear_kernel(x_ref, w_ref, b_ref, o_ref):
    # x: (TM, Din) f32, w: (Din, N) compute_dtype, b: (1, N) f32 -> o: (TM, N) f32
    x = x_ref[...].astype(w_ref.dtype)          # in-kernel cast (no wrapper copy)
    acc = jnp.dot(x, w_ref[...], preferred_element_type=jnp.float32)
    o_ref[...] = (acc + b_ref[...]).astype(o_ref.dtype)


@jax.jit
def _linear_forward(x, w, b):
    """(B, Din) @ (Din, N) + (1, N) -> (B, N) f32, batch-tiled Pallas call."""
    bsz, din = x.shape
    n = w.shape[1]
    tm = _pick_tm(bsz)
    grid = (pl.cdiv(bsz, tm),)                  # partial final block is masked
    flops = 2 * bsz * din * n
    bytes_accessed = int(x.size * x.dtype.itemsize
                         + w.size * w.dtype.itemsize
                         + b.size * 4
                         + bsz * n * 4)
    return pl.pallas_call(
        _linear_kernel,
        out_shape=jax.ShapeDtypeStruct((bsz, n), jnp.float32),
        grid=grid,
        in_specs=[
            pl.BlockSpec((tm, din), lambda i: (i, 0)),   # activations: tiled over M
            pl.BlockSpec((din, n), lambda i: (0, 0)),    # weights: VMEM-resident
            pl.BlockSpec((1, n), lambda i: (0, 0)),      # bias:    VMEM-resident
        ],
        out_specs=pl.BlockSpec((tm, n), lambda i: (i, 0)),
        compiler_params=pltpu.CompilerParams(
            dimension_semantics=("parallel",)),          # shard batch over 2 TCs
        cost_estimate=pl.CostEstimate(flops=flops, transcendentals=0,
                                      bytes_accessed=bytes_accessed),
    )(x, w, b)


# --------------------------------------------------------------------------
# Module
# --------------------------------------------------------------------------
class WatermarkModuleJAX:
    """JAX/Pallas port of WatermarkModule with a Linear(32->10) base.

    compute_dtype: dtype of the MXU matmul operands (f32 default; pass
    jnp.bfloat16 on v6e/v7x to halve weight/activation read bytes and use the
    native bf16 MXU path — accumulation and the bias add stay f32, but expect
    ~1e-2-level drift vs. the f32 reference at these magnitudes).
    """

    def __init__(self, wm_key: str, wm_size: int = 128,
                 base_in: int = 32, seed: int = 0,
                 compute_dtype=jnp.float32):
        self.wm_key = wm_key
        self.wm_size = wm_size
        self.base_in = base_in
        self.compute_dtype = compute_dtype

        key = jax.random.PRNGKey(seed)
        k1, k2, k3, k4 = jax.random.split(key, 4)
        # base: Linear(base_in, 10)   (PyTorch-style uniform init bounds)
        bound_base = 1.0 / jnp.sqrt(base_in)
        self.w_base = jax.random.uniform(
            k1, (base_in, 10), jnp.float32, -bound_base, bound_base)
        self.b_base = jax.random.uniform(
            k2, (10,), jnp.float32, -bound_base, bound_base)
        # fc: Linear(10, wm_size)
        bound_fc = 1.0 / jnp.sqrt(10.0)
        self.w_fc = jax.random.uniform(
            k3, (10, wm_size), jnp.float32, -bound_fc, bound_fc)
        self.b_fc = jax.random.uniform(
            k4, (wm_size,), jnp.float32, -bound_fc, bound_fc)

        # ---- parameters consumed by the kernel (built once, reused) ----
        # Base path: plain Linear(base_in, 10).
        self._w_base_c = self.w_base.astype(compute_dtype)
        self._b_base_row = self.b_base.reshape(1, 10)            # bias stays f32
        # Trigger path: the two linears have no nonlinearity between them, so
        # they are folded into a single Linear(base_in, wm_size) in f32:
        #   W_comb = Wb @ Wf ,  b_comb = bb @ Wf + bf
        w_comb = self.w_base @ self.w_fc                          # (base_in, wm)
        b_comb = self.b_base @ self.w_fc + self.b_fc              # (wm,)
        self._w_comb_c = w_comb.astype(compute_dtype)
        self._b_comb_row = b_comb.reshape(1, wm_size)             # bias stays f32

    def __call__(self, x: jax.Array, *, trigger: bool = False) -> jax.Array:
        if trigger:
            # Forward-value-identical (up to f32 rounding) to fc(base(x).detach());
            # the detach only matters for the backward pass, which this
            # forward-only kernel does not implement.
            # TODO(synk): if this folded path is ever differentiated, unfold it
            # (or add a custom_vjp) so grads reach fc params but not base/x.
            return _linear_forward(x, self._w_comb_c, self._b_comb_row)
        return _linear_forward(x, self._w_base_c, self._b_base_row)


if __name__ == "__main__":
    batch, base_in = 2, 32
    key = jax.random.PRNGKey(0)
    x = jax.random.normal(key, (batch, base_in), jnp.float32)

    module = WatermarkModuleJAX(wm_key="synthetic-key", wm_size=128,
                                base_in=base_in, seed=0)

    # Normal path: returns base logits (B, 10)
    logits = module(x, trigger=False)
    jax.block_until_ready(logits)
    assert logits.shape == (batch, 10)

    # Watermark path: folded single-matmul kernel, returns fc(detached logits)
    wm_out = module(x, trigger=True)
    jax.block_until_ready(wm_out)
    assert wm_out.shape == (batch, 128)

    # Cross-check against plain JAX reference (unfolded math).
    ref_logits = x @ module.w_base + module.b_base
    ref_wm = ref_logits @ module.w_fc + module.b_fc
    assert jnp.allclose(logits, ref_logits, atol=1e-5, rtol=1e-5)
    assert jnp.allclose(wm_out, ref_wm, atol=1e-4, rtol=1e-4)   # f32 fold rounding

    # Exercise the batch-tiled path (grid > 1, partial masked final block).
    big_b = 600   # tm = 304 -> grid = (2,), final block of 296 rows is partial
    xb = jax.random.normal(jax.random.PRNGKey(1), (big_b, base_in), jnp.float32)
    big_logits = module(xb, trigger=False)
    big_wm = module(xb, trigger=True)
    jax.block_until_ready((big_logits, big_wm))
    assert big_logits.shape == (big_b, 10)
    assert big_wm.shape == (big_b, 128)
    ref_big_logits = xb @ module.w_base + module.b_base
    ref_big_wm = ref_big_logits @ module.w_fc + module.b_fc
    assert jnp.allclose(big_logits, ref_big_logits, atol=1e-5, rtol=1e-5)
    assert jnp.allclose(big_wm, ref_big_wm, atol=1e-4, rtol=1e-4)

    print("KERNEL_OK")
</pallas_src>

<mosaic_0001>
module attributes {stable_mosaic.version = 11 : i64} {
  func.func @_linear_kernel(%arg0: i32, %arg1: memref<2x32xf32, #tpu.memory_space<vmem>>, %arg2: memref<32x10xf32, #tpu.memory_space<vmem>>, %arg3: memref<1x10xf32, #tpu.memory_space<vmem>>, %arg4: memref<2x10xf32, #tpu.memory_space<vmem>>) attributes {dimension_semantics = [#tpu.dimension_semantics<parallel>], iteration_bounds = array<i64: 1>, scalar_prefetch = 0 : i64, scratch_operands = 0 : i64, tpu.core_type = #tpu.core_type<tc>, window_params = [{transform_indices = @transform_0, window_bounds = array<i64: 2, 32>}, {pipeline_mode = #tpu.pipeline_mode<synchronous>, transform_indices = @transform_1, window_bounds = array<i64: 32, 10>}, {pipeline_mode = #tpu.pipeline_mode<synchronous>, transform_indices = @transform_2, window_bounds = array<i64: 1, 10>}, {transform_indices = @transform_3, window_bounds = array<i64: 2, 10>}]} {
    %c0 = arith.constant 0 : index
    %c0_0 = arith.constant 0 : index
    %0 = vector.load %arg1[%c0, %c0_0] : memref<2x32xf32, #tpu.memory_space<vmem>>, vector<2x32xf32>
    %c0_1 = arith.constant 0 : index
    %c0_2 = arith.constant 0 : index
    %1 = vector.load %arg2[%c0_1, %c0_2] : memref<32x10xf32, #tpu.memory_space<vmem>>, vector<32x10xf32>
    %cst = arith.constant dense<0.000000e+00> : vector<2x10xf32>
    %2 = tpu.matmul %0, %1, %cst {dimension_numbers = #tpu.dot_dimension_numbers<[1], [0], [0], [1], [0, 0, 1, 1], [], []>} : vector<2x32xf32>, vector<32x10xf32>, vector<2x10xf32> -> vector<2x10xf32>
    %c0_3 = arith.constant 0 : index
    %c0_4 = arith.constant 0 : index
    %3 = vector.load %arg3[%c0_3, %c0_4] : memref<1x10xf32, #tpu.memory_space<vmem>>, vector<1x10xf32>
    %4 = vector.broadcast %3 : vector<1x10xf32> to vector<2x10xf32>
    %5 = arith.addf %2, %4 : vector<2x10xf32>
    %c0_5 = arith.constant 0 : index
    %c0_6 = arith.constant 0 : index
    %6 = vector.load %arg4[%c0_5, %c0_6] : memref<2x10xf32, #tpu.memory_space<vmem>>, vector<2x10xf32>
    tpu.vector_store %arg4[%c0_5, %c0_6], %5 {strides = array<i32>} : memref<2x10xf32, #tpu.memory_space<vmem>>, vector<2x10xf32>,
    return
  }
  func.func @transform_0(%arg0: i32) -> (i32, i32) {
    %c0_i32 = arith.constant 0 : i32
    %c0_i32_0 = arith.constant 0 : i32
    return %arg0, %c0_i32 : i32, i32
  }
  func.func @transform_1(%arg0: i32) -> (i32, i32) {
    %c0_i32 = arith.constant 0 : i32
    %c0_i32_0 = arith.constant 0 : i32
    %c0_i32_1 = arith.constant 0 : i32
    return %c0_i32, %c0_i32_0 : i32, i32
  }
  func.func @transform_2(%arg0: i32) -> (i32, i32) {
    %c0_i32 = arith.constant 0 : i32
    %c0_i32_0 = arith.constant 0 : i32
    %c0_i32_1 = arith.constant 0 : i32
    return %c0_i32, %c0_i32_0 : i32, i32
  }
  func.func @transform_3(%arg0: i32) -> (i32, i32) {
    %c0_i32 = arith.constant 0 : i32
    %c0_i32_0 = arith.constant 0 : i32
    return %arg0, %c0_i32 : i32, i32
  }
}

</mosaic_0001>

<bundles_post_ra>
// kernel: _linear_forward.1
= control target key start
LH: loop header
LB: loop body
LE: loop exit
PB: predicated region body
PF: predicated region fallthrough
CT: control target
= control target key end

     0   :  { %v169_v3 = vmov 0.0|0.0   ;;  %vm170_vm0 = vmmov 0   ;;  %v171_v6 = vmov 0.0   ;;  %s223_s0 = inlined_call_operand.vmem [shape: f32[2,32], index: 0, kind: input, shape index: {}]   ;;  %s224_s1 = inlined_call_operand.vmem [shape: f32[32,10], index: 1, kind: input, shape index: {}]   ;;  %s225_s2 = inlined_call_operand.vmem [shape: f32[1,10], index: 2, kind: input, shape index: {}]   ;;  %s226_s3 = inlined_call_operand.hbm [shape: f32[2,10], index: 3, kind: output, shape index: {}]  }
   0x1   :  { %v16_v0 = vld [vmem:[%s224_s1] sm:$0xff]  ;;  %v17_v1 = vld [vmem:[%s224_s1 + $0x8] sm:$0xff]  ;;  %v18_v2 = vld [vmem:[%s224_s1 + $0x10] sm:$0xff]  ;;  %135 = vmatprep.subr.bf16.mxu0 %v169_v3  ;;  %132 = vmatprep.mubr.msk.f32.mxu0 %vm170_vm0, %v171_v6 }
   0x2   :  { %v136_v4 = vpack.c.bf16 %v17_v1, %v16_v0  ;;  %v19_v5 = vld [vmem:[%s224_s1 + $0x18] sm:$0xff] }
   0x3   :  { %8 = vsyncpa [#allocation3], 0  ;;  %v139_v7 = vpack.c.bf16 %v19_v5, %v18_v2  ;;  %v15_v8 = vld [vmem:[%s223_s0] sm:$0x3]  ;;  %vm27_vm1 = vcmask 261120   ;;  %s172_s24 = smov [#allocation2]  }
   0x4   :  { %137 = vmatpush3.bf16.msra.mxu0 %v136_v4  ;;  %v117_v9 = vld [vmem:[%s225_s2] ss:$0 sm:$0xff]  ;;  %s109_s1 = sshll.u32 %s172_s24, 4  ;;  %vm101_vm2 = vcmask 74752   ;;  %s110_s1 = int_to_ptr.vmem [resolvable:$true] %s109_s1 }
   0x5   :  { %138 = vmatprep.subr.bf16.mxu0 %v169_v3  ;;  %s145_s25 = scalar_lea.vmem %s110_s1, 32  ;;  %p150_p1 = scmp.lt.s32.totalorder %s110_s1, %s110_s1 }
   0x6   :  { %p146_p0 = scmp.ne.s32.totalorder %s110_s1, %s145_s25  ;;  %p151_p2 = scmp.lt.s32.totalorder %s145_s25, %s145_s25 }
   0x8   :  { %140 = vmatpush3.bf16.msra.mxu0 %v139_v7  ;;  %p152_p3 = por %p151_p2, %p150_p1 }
   0xa   :  { %p153_p4 = pnand %p152_p3, %p146_p0 }
   0xb   :  { %133 = vmatmul.mubr.msk.f32.vlgmr.msra.gmra.mrb[0].mxu0 %vm27_vm1, %v15_v8 }
  0xde   :  { %v97_v10 = vpop.f32.mrb[0].mxu0 }
  0xdf   :  { %v98_v11 = vadd.f32 %v117_v9, %v97_v10  ;;  %v134_v12 = vpop.f32.mrb[1].mxu0 }
  0xe1   :  { %102 = vst.msk [vmem:[#allocation2] sm:$0x3] %vm101_vm2, %v98_v11 }
  0xe2   :  { %156 = shalt.err (!%p153_p4)
}
  0xe3   :  { %s157_s27 = scalar_lea.hbm %s226_s3, 32 }
  0xe4   :  { %p158_p5 = scmp.ne.s32.totalorder %s226_s3, %s157_s27  ;;  %p161_p6 = scmp.lt.u32.totalorder %s157_s27, %s226_s3 }
  0xe6   :  { %p163_p7 = pnand %p161_p6, %p158_p5 }
  0xe8   :  { %166 = shalt.err (!%p163_p7)
}
  0xe9   :  { %112 = dma.vmem_to_hbm [thread:$0]  %s110_s1, 32, %s226_s3, [#allocation3]  }
  0xea   :  { %167 = dma.done.wait [#allocation3], 32  }
  0xeb   :  { %168 = vsyncadd [#allocation3], 4294967264 }
  0xec   :  { %116 = vsyncpa [#allocation3], 1 }

</bundles_post_ra>
